<compile_context>
chip_gen: v7x
topology: tpu7x:2x2x1
jax: 0.10.0
libtpu: 0.0.40
codegen_flags: <defaults>
</compile_context>

<pallas_src>
from functools import partial

import jax
import jax.numpy as jnp
from jax import lax
from jax.experimental import pallas as pl
from jax.experimental.pallas import tpu as pltpu

STATE_DIM = 32
ACTION_DIM = 16
HID = 64
MAX_TB = 2048        # batch-tile cap (per-tile VMEM stays << scoped limit)


def _round_up(x, m):
    return ((x + m - 1) // m) * m


def _default_epilogue_dtype():
    # bf16 VPU/EUP exists on v6e / v7x; v5e and older have no bf16 VALU/EUP,
    # so a bf16 epilogue there would just add cast traffic.
    try:
        kind = jax.devices()[0].device_kind.lower()
    except Exception:
        return jnp.float32
    if ("v6" in kind) or ("v7" in kind) or ("7x" in kind):
        return jnp.bfloat16
    return jnp.float32


def gmetric_kernel(s_ref, a_ref, ws_ref, bs_ref, wa_ref, ba_ref,
                   w1s_ref, w1a_ref, b1_ref, wv_ref, bv_ref, out_ref,
                   *, epilogue_dtype):
    ep = epilogue_dtype
    bf16 = jnp.bfloat16
    f32 = jnp.float32

    # Embedding GEMMs: inputs cast to bf16 in-kernel, f32 MXU accumulation.
    hs = jnp.dot(s_ref[...].astype(bf16), ws_ref[...], preferred_element_type=f32)
    ha = jnp.dot(a_ref[...].astype(bf16), wa_ref[...], preferred_element_type=f32)

    # Bias + tanh epilogue (bf16 on v6e/v7x, f32 on v5e).  tanh(concat(s, a))
    # == concat(tanh(s), tanh(a)) since tanh is elementwise.
    hs = jnp.tanh(hs.astype(ep) + bs_ref[...].astype(ep))     # (tb, 64)
    ha = jnp.tanh(ha.astype(ep) + ba_ref[...].astype(ep))     # (tb, 64)

    # affine1: concat([hs, ha], -1) @ W1^T  ==  hs @ W1s + ha @ W1a
    h1 = (jnp.dot(hs.astype(bf16), w1s_ref[...], preferred_element_type=f32) +
          jnp.dot(ha.astype(bf16), w1a_ref[...], preferred_element_type=f32))
    h1 = jnp.tanh(h1 + b1_ref[...])                            # (tb, 64) f32

    # Value head, lane-dense: (1,64) . (tb,64)^T -> (1, tb), so the output
    # store is an unmasked, lane-dense vst instead of a (tb, 1) masked column.
    val = lax.dot_general(wv_ref[...], h1,
                          dimension_numbers=(((1,), (1,)), ((), ())),
                          preferred_element_type=f32)
    out_ref[0] = val + bv_ref[0, 0]                            # (1, tb)


def _choose_tb(batch):
    # Small batches: a single tile whose block dims equal the full array dims
    # (always layout-legal).  Larger batches: an even number of >= 2 grid
    # steps so dimension_semantics=("parallel",) can shard both v7x
    # TensorCores; each tile a multiple of 128 rows for lane-dense output.
    if batch <= 256:
        return batch
    steps = 2 * pl.cdiv(batch, 2 * MAX_TB)
    return _round_up(pl.cdiv(batch, steps), 128)


def gmetric_forward(state, action, params, tb=None, epilogue_dtype=None):
    (ws, bs, wa, ba, w1s, w1a, b1, wv, bv) = params
    B = state.shape[0]
    if tb is None:
        tb = _choose_tb(B)
    if epilogue_dtype is None:
        epilogue_dtype = _default_epilogue_dtype()
    steps = pl.cdiv(B, tb)

    full = lambda shape: pl.BlockSpec(shape, lambda i: (0, 0))  # resident weights

    out = pl.pallas_call(
        partial(gmetric_kernel, epilogue_dtype=epilogue_dtype),
        out_shape=jax.ShapeDtypeStruct((steps, 1, tb), jnp.float32),
        grid_spec=pltpu.PrefetchScalarGridSpec(
            num_scalar_prefetch=0,
            grid=(steps,),
            in_specs=[
                pl.BlockSpec((tb, STATE_DIM), lambda i: (i, 0)),   # state tile (f32)
                pl.BlockSpec((tb, ACTION_DIM), lambda i: (i, 0)),  # action tile (f32)
                full((STATE_DIM, HID)),       # state_emb.weight^T   (bf16)
                full((1, HID)),               # state_emb.bias       (f32)
                full((ACTION_DIM, HID)),      # action_emb.weight^T  (bf16)
                full((1, HID)),               # action_emb.bias      (f32)
                full((HID, HID)),             # affine1.weight^T[:64]  (bf16)
                full((HID, HID)),             # affine1.weight^T[64:]  (bf16)
                full((1, HID)),               # affine1.bias         (f32)
                full((1, HID)),               # value_head.weight row (f32)
                pl.BlockSpec(memory_space=pltpu.MemorySpace.SMEM),  # value_head.bias
            ],
            out_specs=pl.BlockSpec((1, 1, tb), lambda i: (i, 0, 0)),
        ),
        compiler_params=pltpu.CompilerParams(
            dimension_semantics=("parallel",)),
    )(state, action, ws, bs, wa, ba, w1s, w1a, b1, wv, bv)

    # (steps, 1, tb) lane-dense slab -> (B, 1); rows >= B (garbage from the
    # partial last tile, if any) are sliced off here.
    return out.reshape(-1)[:B].reshape(B, 1)


def init_params(key):
    """Deterministic init mimicking nn.Linear default (uniform +-1/sqrt(fan_in))."""
    def linear(k, fan_in, fan_out):
        kw, kb = jax.random.split(k)
        bound = 1.0 / jnp.sqrt(fan_in)
        w = jax.random.uniform(kw, (fan_out, fan_in), jnp.float32, -bound, bound)
        b = jax.random.uniform(kb, (fan_out,), jnp.float32, -bound, bound)
        return w, b

    k1, k2, k3, k4 = jax.random.split(key, 4)
    w_s, b_s = linear(k1, STATE_DIM, HID)      # state_emb
    w_a, b_a = linear(k2, ACTION_DIM, HID)     # action_emb
    w_1, b_1 = linear(k3, 2 * HID, HID)        # affine1 (128 -> 64)
    w_v, b_v = linear(k4, HID, 1)              # value_head
    w_v = w_v * 0.1                            # .weight.data.mul_(0.1)
    b_v = b_v * 0.0                            # .bias.data.mul_(0.0)

    w1 = w_1.T                                 # (128, 64); rows 0..63 hit the state half
    return (w_s.T.astype(jnp.bfloat16), b_s.reshape(1, HID),
            w_a.T.astype(jnp.bfloat16), b_a.reshape(1, HID),
            w1[:HID].astype(jnp.bfloat16),     # W1s: multiplies tanh(state_emb)
            w1[HID:].astype(jnp.bfloat16),     # W1a: multiplies tanh(action_emb)
            b_1.reshape(1, HID),
            w_v.reshape(1, HID),               # value head as a broadcast row (f32)
            b_v.reshape(1, 1))


def reference_forward(state, action, params, epilogue_dtype=jnp.float32):
    """Pure-JAX reference mirroring the kernel's bf16 rounding / epilogue path."""
    (ws, bs, wa, ba, w1s, w1a, b1, wv, bv) = params
    f32 = jnp.float32
    ep = epilogue_dtype
    s = state.astype(jnp.bfloat16).astype(f32)
    a = action.astype(jnp.bfloat16).astype(f32)
    hs = s @ ws.astype(f32)
    ha = a @ wa.astype(f32)
    hs = jnp.tanh(hs.astype(ep) + bs.astype(ep)).astype(jnp.bfloat16)
    ha = jnp.tanh(ha.astype(ep) + ba.astype(ep)).astype(jnp.bfloat16)
    h1 = hs.astype(f32) @ w1s.astype(f32) + ha.astype(f32) @ w1a.astype(f32)
    h1 = jnp.tanh(h1 + b1)
    return h1 @ wv.T + bv


if __name__ == "__main__":
    key = jax.random.PRNGKey(0)
    kp, ks, ka = jax.random.split(key, 3)

    B = 8
    state = jax.random.normal(ks, (B, STATE_DIM), jnp.float32)
    action = jax.random.normal(ka, (B, ACTION_DIM), jnp.float32)
    params = init_params(kp)

    ep = _default_epilogue_dtype()
    out = gmetric_forward(state, action, params, epilogue_dtype=ep)
    out = jax.block_until_ready(out)

    ref = reference_forward(state, action, params, epilogue_dtype=ep)
    tol = 5e-3 if ep == jnp.bfloat16 else 1.5e-3   # bf16 epilogue + EUP tanh vs XLA tanh
    assert out.shape == (B, 1)
    assert jnp.allclose(out, ref, atol=tol, rtol=tol)

    print("KERNEL_OK")
</pallas_src>

<mosaic_0001>
module attributes {stable_mosaic.version = 11 : i64} {
  func.func @gmetric_kernel(%arg0: i32, %arg1: memref<8x32xf32, #tpu.memory_space<vmem>>, %arg2: memref<8x16xf32, #tpu.memory_space<vmem>>, %arg3: memref<32x64xbf16, #tpu.memory_space<vmem>>, %arg4: memref<1x64xf32, #tpu.memory_space<vmem>>, %arg5: memref<16x64xbf16, #tpu.memory_space<vmem>>, %arg6: memref<1x64xf32, #tpu.memory_space<vmem>>, %arg7: memref<64x64xbf16, #tpu.memory_space<vmem>>, %arg8: memref<64x64xbf16, #tpu.memory_space<vmem>>, %arg9: memref<1x64xf32, #tpu.memory_space<vmem>>, %arg10: memref<1x64xf32, #tpu.memory_space<vmem>>, %arg11: memref<1x1xf32, #tpu.memory_space<smem>>, %arg12: memref<1x1x8xf32, #tpu.memory_space<vmem>>) attributes {dimension_semantics = [#tpu.dimension_semantics<parallel>], iteration_bounds = array<i64: 1>, scalar_prefetch = 0 : i64, scratch_operands = 0 : i64, tpu.core_type = #tpu.core_type<tc>, window_params = [{transform_indices = @transform_0, window_bounds = array<i64: 8, 32>}, {transform_indices = @transform_1, window_bounds = array<i64: 8, 16>}, {pipeline_mode = #tpu.pipeline_mode<synchronous>, transform_indices = @transform_2, window_bounds = array<i64: 32, 64>}, {pipeline_mode = #tpu.pipeline_mode<synchronous>, transform_indices = @transform_3, window_bounds = array<i64: 1, 64>}, {pipeline_mode = #tpu.pipeline_mode<synchronous>, transform_indices = @transform_4, window_bounds = array<i64: 16, 64>}, {pipeline_mode = #tpu.pipeline_mode<synchronous>, transform_indices = @transform_5, window_bounds = array<i64: 1, 64>}, {pipeline_mode = #tpu.pipeline_mode<synchronous>, transform_indices = @transform_6, window_bounds = array<i64: 64, 64>}, {pipeline_mode = #tpu.pipeline_mode<synchronous>, transform_indices = @transform_7, window_bounds = array<i64: 64, 64>}, {pipeline_mode = #tpu.pipeline_mode<synchronous>, transform_indices = @transform_8, window_bounds = array<i64: 1, 64>}, {pipeline_mode = #tpu.pipeline_mode<synchronous>, transform_indices = @transform_9, window_bounds = array<i64: 1, 64>}, {transform_indices = @transform_10, window_bounds = array<i64: 1, 1>}, {transform_indices = @transform_11, window_bounds = array<i64: 1, 1, 8>}]} {
    %c0 = arith.constant 0 : index
    %c0_0 = arith.constant 0 : index
    %0 = vector.load %arg1[%c0, %c0_0] : memref<8x32xf32, #tpu.memory_space<vmem>>, vector<8x32xf32>
    %1 = arith.truncf %0 : vector<8x32xf32> to vector<8x32xbf16>
    %c0_1 = arith.constant 0 : index
    %c0_2 = arith.constant 0 : index
    %2 = vector.load %arg3[%c0_1, %c0_2] : memref<32x64xbf16, #tpu.memory_space<vmem>>, vector<32x64xbf16>
    %cst = arith.constant dense<0.000000e+00> : vector<8x64xf32>
    %3 = tpu.matmul %1, %2, %cst {dimension_numbers = #tpu.dot_dimension_numbers<[1], [0], [0], [1], [0, 0, 1, 1], [], []>} : vector<8x32xbf16>, vector<32x64xbf16>, vector<8x64xf32> -> vector<8x64xf32>
    %c0_3 = arith.constant 0 : index
    %c0_4 = arith.constant 0 : index
    %4 = vector.load %arg2[%c0_3, %c0_4] : memref<8x16xf32, #tpu.memory_space<vmem>>, vector<8x16xf32>
    %5 = arith.truncf %4 : vector<8x16xf32> to vector<8x16xbf16>
    %c0_5 = arith.constant 0 : index
    %c0_6 = arith.constant 0 : index
    %6 = vector.load %arg5[%c0_5, %c0_6] : memref<16x64xbf16, #tpu.memory_space<vmem>>, vector<16x64xbf16>
    %cst_7 = arith.constant dense<0.000000e+00> : vector<8x64xf32>
    %7 = tpu.matmul %5, %6, %cst_7 {dimension_numbers = #tpu.dot_dimension_numbers<[1], [0], [0], [1], [0, 0, 1, 1], [], []>} : vector<8x16xbf16>, vector<16x64xbf16>, vector<8x64xf32> -> vector<8x64xf32>
    %c0_8 = arith.constant 0 : index
    %c0_9 = arith.constant 0 : index
    %8 = vector.load %arg4[%c0_8, %c0_9] : memref<1x64xf32, #tpu.memory_space<vmem>>, vector<1x64xf32>
    %9 = vector.broadcast %8 : vector<1x64xf32> to vector<8x64xf32>
    %10 = arith.addf %3, %9 : vector<8x64xf32>
    %11 = math.tanh %10 : vector<8x64xf32>
    %c0_10 = arith.constant 0 : index
    %c0_11 = arith.constant 0 : index
    %12 = vector.load %arg6[%c0_10, %c0_11] : memref<1x64xf32, #tpu.memory_space<vmem>>, vector<1x64xf32>
    %13 = vector.broadcast %12 : vector<1x64xf32> to vector<8x64xf32>
    %14 = arith.addf %7, %13 : vector<8x64xf32>
    %15 = math.tanh %14 : vector<8x64xf32>
    %16 = arith.truncf %11 : vector<8x64xf32> to vector<8x64xbf16>
    %c0_12 = arith.constant 0 : index
    %c0_13 = arith.constant 0 : index
    %17 = vector.load %arg7[%c0_12, %c0_13] : memref<64x64xbf16, #tpu.memory_space<vmem>>, vector<64x64xbf16>
    %cst_14 = arith.constant dense<0.000000e+00> : vector<8x64xf32>
    %18 = tpu.matmul %16, %17, %cst_14 {dimension_numbers = #tpu.dot_dimension_numbers<[1], [0], [0], [1], [0, 0, 1, 1], [], []>} : vector<8x64xbf16>, vector<64x64xbf16>, vector<8x64xf32> -> vector<8x64xf32>
    %19 = arith.truncf %15 : vector<8x64xf32> to vector<8x64xbf16>
    %c0_15 = arith.constant 0 : index
    %c0_16 = arith.constant 0 : index
    %20 = vector.load %arg8[%c0_15, %c0_16] : memref<64x64xbf16, #tpu.memory_space<vmem>>, vector<64x64xbf16>
    %cst_17 = arith.constant dense<0.000000e+00> : vector<8x64xf32>
    %21 = tpu.matmul %19, %20, %cst_17 {dimension_numbers = #tpu.dot_dimension_numbers<[1], [0], [0], [1], [0, 0, 1, 1], [], []>} : vector<8x64xbf16>, vector<64x64xbf16>, vector<8x64xf32> -> vector<8x64xf32>
    %22 = arith.addf %18, %21 : vector<8x64xf32>
    %c0_18 = arith.constant 0 : index
    %c0_19 = arith.constant 0 : index
    %23 = vector.load %arg9[%c0_18, %c0_19] : memref<1x64xf32, #tpu.memory_space<vmem>>, vector<1x64xf32>
    %24 = vector.broadcast %23 : vector<1x64xf32> to vector<8x64xf32>
    %25 = arith.addf %22, %24 : vector<8x64xf32>
    %26 = math.tanh %25 : vector<8x64xf32>
    %c0_20 = arith.constant 0 : index
    %c0_21 = arith.constant 0 : index
    %27 = vector.load %arg10[%c0_20, %c0_21] : memref<1x64xf32, #tpu.memory_space<vmem>>, vector<1x64xf32>
    %cst_22 = arith.constant dense<0.000000e+00> : vector<1x8xf32>
    %28 = tpu.matmul %27, %26, %cst_22 {dimension_numbers = #tpu.dot_dimension_numbers<[1], [1], [0], [0], [0, 0, 1, 0], [], []>} : vector<1x64xf32>, vector<8x64xf32>, vector<1x8xf32> -> vector<1x8xf32>
    %c0_23 = arith.constant 0 : index
    %c0_24 = arith.constant 0 : index
    %29 = memref.load %arg11[%c0_23, %c0_24] : memref<1x1xf32, #tpu.memory_space<smem>>
    %30 = vector.broadcast %29 : f32 to vector<1x8xf32>
    %31 = arith.addf %28, %30 : vector<1x8xf32>
    %c0_25 = arith.constant 0 : index
    %c0_26 = arith.constant 0 : index
    %c0_27 = arith.constant 0 : index
    %32 = vector.load %arg12[%c0_25, %c0_26, %c0_27] : memref<1x1x8xf32, #tpu.memory_space<vmem>>, vector<1x1x8xf32>
    %33 = vector.shape_cast %32 : vector<1x1x8xf32> to vector<1x8xf32>
    %34 = vector.shape_cast %31 : vector<1x8xf32> to vector<1x1x8xf32>
    tpu.vector_store %arg12[%c0_25, %c0_26, %c0_27], %34 {strides = array<i32>} : memref<1x1x8xf32, #tpu.memory_space<vmem>>, vector<1x1x8xf32>,
    return
  }
  func.func @transform_0(%arg0: i32) -> (i32, i32) {
    %c0_i32 = arith.constant 0 : i32
    %c0_i32_0 = arith.constant 0 : i32
    return %arg0, %c0_i32 : i32, i32
  }
  func.func @transform_1(%arg0: i32) -> (i32, i32) {
    %c0_i32 = arith.constant 0 : i32
    %c0_i32_0 = arith.constant 0 : i32
    return %arg0, %c0_i32 : i32, i32
  }
  func.func @transform_2(%arg0: i32) -> (i32, i32) {
    %c0_i32 = arith.constant 0 : i32
    %c0_i32_0 = arith.constant 0 : i32
    %c0_i32_1 = arith.constant 0 : i32
    return %c0_i32, %c0_i32_0 : i32, i32
  }
  func.func @transform_3(%arg0: i32) -> (i32, i32) {
    %c0_i32 = arith.constant 0 : i32
    %c0_i32_0 = arith.constant 0 : i32
    %c0_i32_1 = arith.constant 0 : i32
    return %c0_i32, %c0_i32_0 : i32, i32
  }
  func.func @transform_4(%arg0: i32) -> (i32, i32) {
    %c0_i32 = arith.constant 0 : i32
    %c0_i32_0 = arith.constant 0 : i32
    %c0_i32_1 = arith.constant 0 : i32
    return %c0_i32, %c0_i32_0 : i32, i32
  }
  func.func @transform_5(%arg0: i32) -> (i32, i32) {
    %c0_i32 = arith.constant 0 : i32
    %c0_i32_0 = arith.constant 0 : i32
    %c0_i32_1 = arith.constant 0 : i32
    return %c0_i32, %c0_i32_0 : i32, i32
  }
  func.func @transform_6(%arg0: i32) -> (i32, i32) {
    %c0_i32 = arith.constant 0 : i32
    %c0_i32_0 = arith.constant 0 : i32
    %c0_i32_1 = arith.constant 0 : i32
    return %c0_i32, %c0_i32_0 : i32, i32
  }
  func.func @transform_7(%arg0: i32) -> (i32, i32) {
    %c0_i32 = arith.constant 0 : i32
    %c0_i32_0 = arith.constant 0 : i32
    %c0_i32_1 = arith.constant 0 : i32
    return %c0_i32, %c0_i32_0 : i32, i32
  }
  func.func @transform_8(%arg0: i32) -> (i32, i32) {
    %c0_i32 = arith.constant 0 : i32
    %c0_i32_0 = arith.constant 0 : i32
    %c0_i32_1 = arith.constant 0 : i32
    return %c0_i32, %c0_i32_0 : i32, i32
  }
  func.func @transform_9(%arg0: i32) -> (i32, i32) {
    %c0_i32 = arith.constant 0 : i32
    %c0_i32_0 = arith.constant 0 : i32
    %c0_i32_1 = arith.constant 0 : i32
    return %c0_i32, %c0_i32_0 : i32, i32
  }
  func.func @transform_10(%arg0: i32) -> (i32, i32) {
    %c0_i32 = arith.constant 0 : i32
    %c0_i32_0 = arith.constant 0 : i32
    %c0_i32_1 = arith.constant 0 : i32
    return %c0_i32, %c0_i32_0 : i32, i32
  }
  func.func @transform_11(%arg0: i32) -> (i32, i32, i32) {
    %c0_i32 = arith.constant 0 : i32
    %c0_i32_0 = arith.constant 0 : i32
    %c0_i32_1 = arith.constant 0 : i32
    return %arg0, %c0_i32, %c0_i32_0 : i32, i32, i32
  }
}

</mosaic_0001>

<bundles_post_ra>
// kernel: tpu_custom_call.1
= control target key start
LH: loop header
LB: loop body
LE: loop exit
PB: predicated region body
PF: predicated region fallthrough
CT: control target
= control target key end

     0   :  { %17 = vsyncpa [#allocation4], 0  ;;  %s939_s0 = inlined_call_operand.hbm [shape: f32[8,32], index: 0, kind: input, shape index: {}]   ;;  %s940_s1 = inlined_call_operand.hbm [shape: f32[8,16], index: 1, kind: input, shape index: {}]   ;;  %s941_s2 = inlined_call_operand.hbm [shape: bf16[32,64], index: 2, kind: input, shape index: {}]   ;;  %s942_s3 = inlined_call_operand.vmem [shape: f32[1,64], index: 3, kind: input, shape index: {}]   ;;  %s943_s4 = inlined_call_operand.vmem [shape: bf16[16,64], index: 4, kind: input, shape index: {}]   ;;  %s944_s5 = inlined_call_operand.vmem [shape: f32[1,64], index: 5, kind: input, shape index: {}]   ;;  %s945_s6 = inlined_call_operand.hbm [shape: bf16[64,64], index: 6, kind: input, shape index: {}]   ;;  %s946_s7 = inlined_call_operand.hbm [shape: bf16[64,64], index: 7, kind: input, shape index: {}]   ;;  %s947_s8 = inlined_call_operand.vmem [shape: f32[1,64], index: 8, kind: input, shape index: {}]   ;;  %s948_s9 = inlined_call_operand.vmem [shape: f32[1,64], index: 9, kind: input, shape index: {}]   ;;  %s949_s10 = inlined_call_operand.<no memory space> [shape: f32[1,1], index: 10, kind: input, shape index: {}]   ;;  %s950_s11 = inlined_call_operand.hbm [shape: f32[1,1,8], index: 11, kind: output, shape index: {}]  }
   0x1   :  { %18 = vsyncpa [#allocation7], 0 }
   0x2   :  { %19 = vsyncpa [#allocation10], 0 }
   0x3   :  { %20 = vsyncpa [#allocation5], 0  ;;  %s744_s17 = smov [#allocation6]   ;;  %s604_s21 = scalar_lea.hbm %s940_s1, 128 }
   0x4   :  { %s37_s18 = sshll.u32 %s744_s17, 4  ;;  %p605_p0 = scmp.ne.s32.totalorder %s940_s1, %s604_s21  ;;  %s38_s18 = int_to_ptr.vmem [resolvable:$true] %s37_s18 }
   0x5   :  { %p608_p1 = scmp.lt.u32.totalorder %s604_s21, %s940_s1 }
   0x7   :  { %p610_p2 = pnand %p608_p1, %p605_p0 }
   0x9   :  { %613 = shalt.err (!%p610_p2)
}
   0xa   :  { %s614_s26 = scalar_lea.vmem %s38_s18, 128  ;;  %p619_p4 = scmp.lt.s32.totalorder %s38_s18, %s38_s18 }
   0xb   :  { %p615_p3 = scmp.ne.s32.totalorder %s38_s18, %s614_s26  ;;  %p620_p5 = scmp.lt.s32.totalorder %s614_s26, %s614_s26 }
   0xd   :  { %p621_p6 = por %p620_p5, %p619_p4 }
   0xf   :  { %p622_p7 = pnand %p621_p6, %p615_p3 }
  0x11   :  { %625 = shalt.err (!%p622_p7)
}
  0x12   :  { %40 = dma.hbm_to_vmem [thread:$0]  %s940_s1, 128, %s38_s18, [#allocation7]  }
  0x13   :  { %s745_s29 = smov [#allocation9]   ;;  %s746_s12 = smov [#allocation3]  }
  0x14   :  { %s64_s30 = sshll.u32 %s745_s29, 4  ;;  %s27_s13 = sshll.u32 %s746_s12, 4  ;;  %s65_s30 = int_to_ptr.vmem [resolvable:$true] %s64_s30  ;;  %s28_s13 = int_to_ptr.vmem [resolvable:$true] %s27_s13 }
  0x15   :  { %s626_s16 = scalar_lea.hbm %s945_s6, 512 }
  0x16   :  { %p627_p8 = scmp.ne.s32.totalorder %s945_s6, %s626_s16  ;;  %p630_p9 = scmp.lt.u32.totalorder %s626_s16, %s945_s6 }
  0x18   :  { %p632_p10 = pnand %p630_p9, %p627_p8 }
  0x1a   :  { %635 = shalt.err (!%p632_p10)
}
  0x1b   :  { %s636_s1 = scalar_lea.vmem %s65_s30, 512  ;;  %p641_p12 = scmp.lt.s32.totalorder %s65_s30, %s65_s30 }
  0x1c   :  { %p637_p11 = scmp.ne.s32.totalorder %s65_s30, %s636_s1  ;;  %p642_p13 = scmp.lt.s32.totalorder %s636_s1, %s636_s1 }
  0x1e   :  { %p643_p0 = por %p642_p13, %p641_p12 }
  0x20   :  { %p644_p1 = pnand %p643_p0, %p637_p11 }
  0x22   :  { %647 = shalt.err (!%p644_p1)
}
  0x23   :  { %s747_s18 = smov 64   ;;  %s748_s22 = smov 4  }
  0x24   :  { %70 = dma.hbm_to_vmem [thread:$0]  %s945_s6, 512, %s65_s30, [#allocation10], %s747_s18, %s747_s18, %s748_s22  }
  0x25   :  { %s648_s27 = scalar_lea.hbm %s939_s0, 128 }
  0x26   :  { %p649_p2 = scmp.ne.s32.totalorder %s939_s0, %s648_s27  ;;  %p652_p3 = scmp.lt.u32.totalorder %s648_s27, %s939_s0 }
  0x28   :  { %p654_p4 = pnand %p652_p3, %p649_p2 }
  0x2a   :  { %657 = shalt.err (!%p654_p4)
}
  0x2b   :  { %s658_s15 = scalar_lea.vmem %s28_s13, 128  ;;  %p663_p6 = scmp.lt.s32.totalorder %s28_s13, %s28_s13 }
  0x2c   :  { %p659_p5 = scmp.ne.s32.totalorder %s28_s13, %s658_s15  ;;  %p664_p7 = scmp.lt.s32.totalorder %s658_s15, %s658_s15 }
  0x2e   :  { %p665_p8 = por %p664_p7, %p663_p6 }
  0x30   :  { %p666_p9 = pnand %p665_p8, %p659_p5 }
  0x32   :  { %669 = shalt.err (!%p666_p9)
}
  0x33   :  { %30 = dma.hbm_to_vmem [thread:$0]  %s939_s0, 128, %s28_s13, [#allocation4]  }
  0x34   :  { %s749_s16 = smov [#allocation8]   ;;  %s750_s19 = smov [#allocation11]  }
  0x35   :  { %s46_s17 = sshll.u32 %s749_s16, 4  ;;  %s76_s20 = sshll.u32 %s750_s19, 4  ;;  %s47_s17 = int_to_ptr.vmem [resolvable:$true] %s46_s17  ;;  %s77_s20 = int_to_ptr.vmem [resolvable:$true] %s76_s20 }
  0x36   :  { %s670_s23 = scalar_lea.hbm %s941_s2, 256 }
  0x37   :  { %p671_p10 = scmp.ne.s32.totalorder %s941_s2, %s670_s23  ;;  %p674_p11 = scmp.lt.u32.totalorder %s670_s23, %s941_s2 }
  0x39   :  { %p676_p12 = pnand %p674_p11, %p671_p10 }
  0x3b   :  { %679 = shalt.err (!%p676_p12)
}
  0x3c   :  { %s680_s0 = scalar_lea.vmem %s47_s17, 256  ;;  %p685_p0 = scmp.lt.s32.totalorder %s47_s17, %s47_s17 }
  0x3d   :  { %p681_p13 = scmp.ne.s32.totalorder %s47_s17, %s680_s0  ;;  %p686_p1 = scmp.lt.s32.totalorder %s680_s0, %s680_s0 }
  0x3f   :  { %p687_p2 = por %p686_p1, %p685_p0 }
  0x41   :  { %p688_p3 = pnand %p687_p2, %p681_p13 }
  0x43   :  { %691 = shalt.err (!%p688_p3)
}
  0x44   :  { %52 = dma.hbm_to_vmem [thread:$0]  %s941_s2, 256, %s47_s17, [#allocation7], %s747_s18, %s747_s18, %s748_s22  }
  0x45   :  { %s692_s14 = scalar_lea.hbm %s946_s7, 512 }
  0x46   :  { %p693_p4 = scmp.ne.s32.totalorder %s946_s7, %s692_s14  ;;  %p696_p5 = scmp.lt.u32.totalorder %s692_s14, %s946_s7 }
  0x48   :  { %p698_p6 = pnand %p696_p5, %p693_p4 }
  0x4a   :  { %701 = shalt.err (!%p698_p6)
}
  0x4b   :  { %s702_s19 = scalar_lea.vmem %s77_s20, 512  ;;  %p707_p8 = scmp.lt.s32.totalorder %s77_s20, %s77_s20 }
  0x4c   :  { %p703_p7 = scmp.ne.s32.totalorder %s77_s20, %s702_s19  ;;  %p708_p9 = scmp.lt.s32.totalorder %s702_s19, %s702_s19 }
  0x4e   :  { %p709_p10 = por %p708_p9, %p707_p8 }
  0x50   :  { %p710_p11 = pnand %p709_p10, %p703_p7 }
  0x52   :  { %713 = shalt.err (!%p710_p11)
}
  0x53   :  { %82 = dma.hbm_to_vmem [thread:$0]  %s946_s7, 512, %s77_s20, [#allocation10], %s747_s18, %s747_s18, %s748_s22  }
  0x54   :  { %736 = dma.done.wait [#allocation4], 128  }
  0x55   :  { %737 = vsyncadd [#allocation4], 4294967168 }
  0x56   :  { %738 = dma.done.wait [#allocation7], 384  }
  0x57   :  { %739 = vsyncadd [#allocation7], 4294966912 }
  0x58   :  { %740 = dma.done.wait [#allocation10], 1024  }
  0x59   :  { %741 = vsyncadd [#allocation10], 4294966272  ;;  %v751_v0 = vmov 0.0   ;;  %vm752_vm0 = vmmov 0   ;;  %v587_v1 = vld [vmem:[#allocation8] sm:$0xff]   ;;  %v588_v2 = vld [vmem:[%s943_s4] sm:$0xff]   ;;  %v401_v45 = vstv %s949_s10 }
  0x5a   :  { %534 = vmatprep.subr.bf16.mxu0 %v751_v0  ;;  %542 = vmatprep.subr.bf16.mxu1 %v751_v0  ;;  %v589_v3 = vld [vmem:[#allocation8 + $0x8] sm:$0xff]   ;;  %v111_v4 = vld [vmem:[#allocation6] sm:$0xff]  ;;  %vm192_vm1 = vcmask 130048   ;;  %v105_v5 = vld [vmem:[#allocation3] sm:$0xff]  ;;  %vm134_vm2 = vcmask 261120   ;;  %vm279_vm3 = vcmask 523264  }
  0x5b   :  { %544 = vmatprep.mubr.msk.bf16.mxu1 %vm752_vm0, %v751_v0  ;;  %538 = vmatprep.mubr.msk.bf16.mxu0 %vm752_vm0, %v751_v0  ;;  %v112_v6 = vpack.c.bf16 %v111_v4, %v111_v4  ;;  %v106_v7 = vpack.c.bf16 %v105_v5, %v105_v5  ;;  %v590_v8 = vld [vmem:[#allocation11] sm:$0xff]   ;;  %v592_v10 = vld [vmem:[#allocation11 + $0x8] sm:$0xff]   ;;  %v594_v12 = vld [vmem:[#allocation11 + $0x10] sm:$0xff]   ;;  %vm478_vm4 = vcmask 57344  }
  0x5c   :  { %535 = vmatpush3.bf16.msra.mxu0 %v587_v1  ;;  %543 = vmatpush3.bf16.msra.mxu1 %v588_v2  ;;  %v591_v9 = vld [vmem:[#allocation9] sm:$0xff]   ;;  %v593_v11 = vld [vmem:[#allocation9 + $0x8] sm:$0xff]   ;;  %v595_v13 = vld [vmem:[#allocation9 + $0x10] sm:$0xff]  }
  0x5d   :  { %536 = vmatprep.subr.bf16.mxu0 %v751_v0  ;;  %548 = vmatprep.subr.bf16.mxu1 %v751_v0  ;;  %v596_v14 = vld [vmem:[#allocation11 + $0x18] sm:$0xff]   ;;  %v501_v16 = vld [vmem:[%s944_s5] ss:$0 sm:$0xff] }
  0x5e   :  { %v597_v15 = vld [vmem:[#allocation9 + $0x18] sm:$0xff]   ;;  %v497_v20 = vld [vmem:[%s942_s3] ss:$0 sm:$0xff] }
  0x5f   :  { %545 = vmatmul.mubr.msk.bf16.vlgmr.msra.gmra.mrb[0].mxu1 %vm192_vm1, %v112_v6  ;;  %v514_v37 = vld [vmem:[%s947_s8] ss:$0 sm:$0xff]  ;;  %s753_s8 = smov [#allocation12]  }
  0x60   :  { %537 = vmatpush3.bf16.msra.mxu0 %v589_v3  ;;  %556 = vmatprep.mubr.msk.bf16.mxu1 %vm752_vm0, %v751_v0  ;;  %v399_v44 = vld [vmem:[%s948_s9] sm:$0x1]  ;;  %s486_s26 = sshll.u32 %s753_s8, 4  ;;  %s487_s26 = int_to_ptr.vmem [resolvable:$true] %s486_s26 }
  0x61   :  { %560 = vmatprep.subr.bf16.mxu0 %v751_v0  ;;  %549 = vmatpush3.bf16.msra.mxu1 %v590_v8  ;;  %s714_s27 = scalar_lea.vmem %s487_s26, 16  ;;  %s718_s0 = scalar_lea.vmem %s487_s26, 32 }
  0x62   :  { %550 = vmatprep.subr.bf16.mxu1 %v751_v0  ;;  %p715_p12 = scmp.ne.s32.totalorder %s487_s26, %s714_s27  ;;  %p719_p13 = scmp.lt.s32.totalorder %s487_s26, %s487_s26 }
  0x63   :  { %539 = vmatmul.mubr.msk.bf16.vlgmr.msra.gmra.mrb[0].mxu0 %vm134_vm2, %v106_v7  ;;  %p720_p0 = scmp.lt.s32.totalorder %s718_s0, %s714_s27 }
  0x64   :  { %568 = vmatprep.mubr.msk.bf16.mxu0 %vm752_vm0, %v751_v0  ;;  %561 = vmatpush3.bf16.msra.mxu0 %v591_v9 }
  0x65   :  { %551 = vmatpush3.bf16.msra.mxu1 %v592_v10  ;;  %562 = vmatprep.subr.bf16.mxu0 %v751_v0  ;;  %p721_p1 = por %p720_p0, %p719_p13 }
  0x66   :  { %552 = vmatprep.subr.bf16.mxu1 %v751_v0 }
  0x67   :  { %p722_p2 = pnand %p721_p1, %p715_p12 }
  0x68   :  { %563 = vmatpush3.bf16.msra.mxu0 %v593_v11 }
  0x69   :  { %553 = vmatpush3.bf16.msra.mxu1 %v594_v12  ;;  %564 = vmatprep.subr.bf16.mxu0 %v751_v0 }
  0x6a   :  { %554 = vmatprep.subr.bf16.mxu1 %v751_v0 }
  0x6c   :  { %565 = vmatpush3.bf16.msra.mxu0 %v595_v13 }
  0x6d   :  { %555 = vmatpush3.bf16.msra.mxu1 %v596_v14  ;;  %566 = vmatprep.subr.bf16.mxu0 %v751_v0 }
  0x6e   :  { %572 = vmatprep.subr.mxu1 %v751_v0 }
  0x70   :  { %567 = vmatpush3.bf16.msra.mxu0 %v597_v15 }
 0x132   :  { %v230_v17 = vpop.f32.mrb[0].mxu1 }
 0x133   :  { %v231_v18 = vadd.f32 %v501_v16, %v230_v17  ;;  %v546_v19 = vpop.f32.mrb[1].mxu1 }
 0x134   :  { %v233_v21 = vpop.f32.mrb[2].mxu1 }
 0x135   :  { %598 = vtanh.f32 %v231_v18  ;;  %v547_v23 = vpop.f32.mrb[3].mxu1 }
 0x136   :  { %v172_v22 = vpop.f32.mrb[0].mxu0 }
 0x137   :  { %v173_v24 = vadd.f32 %v497_v20, %v172_v22  ;;  %v540_v25 = vpop.f32.mrb[1].mxu0 }
 0x138   :  { %v175_v26 = vpop.f32.mrb[2].mxu0 }
 0x139   :  { %600 = vtanh.f32 %v173_v24  ;;  %v541_v27 = vpop.f32.mrb[3].mxu0 }
 0x13f   :  { %v599_v28 = vpop.eup %598 }
 0x140   :  { %v246_v29 = vpack.c.bf16 %v599_v28, %v599_v28 }
 0x142   :  { %557 = vmatmul.mubr.msk.bf16.vlgmr.msra.gmra.mrb[4].mxu1 %vm279_vm3, %v246_v29 }
 0x143   :  { %v601_v30 = vpop.eup %600  ;;  %574 = vmatprep.mubr.msk.f32.mxu1 %vm752_vm0, %v751_v0 }
 0x144   :  { %v237_v31 = vpack.c.bf16 %v601_v30, %v601_v30 }
 0x146   :  { %569 = vmatmul.mubr.msk.bf16.vlgmr.msra.gmra.mrb[4].mxu0 %vm279_vm3, %v237_v31 }
 0x215   :  { %v317_v32 = vpop.f32.mrb[4].mxu1 }
 0x216   :  { %v558_v33 = vpop.f32.mrb[5].mxu1 }
 0x217   :  { %v320_v34 = vpop.f32.mrb[6].mxu1 }
 0x218   :  { %v559_v35 = vpop.f32.mrb[7].mxu1 }
 0x219   :  { %v384_v36 = vpop.f32.mrb[4].mxu0 }
 0x21a   :  { %v385_v38 = vadd.f32 %v384_v36, %v317_v32  ;;  %v570_v39 = vpop.f32.mrb[5].mxu0 }
 0x21b   :  { %v387_v40 = vpop.f32.mrb[6].mxu0 }
 0x21c   :  { %v397_v41 = vadd.f32 %v514_v37, %v385_v38  ;;  %v571_v42 = vpop.f32.mrb[7].mxu0 }
 0x21e   :  { %602 = vtanh.f32 %v397_v41 }
 0x228   :  { %v603_v43 = vpop.eup %602 }
 0x229   :  { %573 = vmatpush3.xpose.msk.msra.mxu1 %vm279_vm3, %v603_v43 }
 0x22c   :  { %575 = vmatmul.mubr.msk.f32.vlgmr.msra.gmra.mrb[8].mxu1 %vm279_vm3, %v399_v44 }
 0x2ff   :  { %v474_v46 = vpop.f32.mrb[8].mxu1 }
 0x300   :  { %v475_v47 = vadd.f32 %v474_v46, %v401_v45  ;;  %v576_v48 = vpop.f32.mrb[9].mxu1 }
 0x302   :  { %479 = vst.msk [vmem:[#allocation12] sm:$0x1] %vm478_vm4, %v475_v47 }
 0x303   :  { %725 = shalt.err (!%p722_p2)
}
 0x304   :  { %s726_s10 = scalar_lea.hbm %s950_s11, 16 }
 0x305   :  { %p727_p3 = scmp.ne.s32.totalorder %s950_s11, %s726_s10  ;;  %p730_p4 = scmp.lt.u32.totalorder %s726_s10, %s950_s11 }
 0x307   :  { %p732_p5 = pnand %p730_p4, %p727_p3 }
 0x309   :  { %735 = shalt.err (!%p732_p5)
}
 0x30a   :  { %489 = dma.vmem_to_hbm [thread:$0]  %s487_s26, 16, %s950_s11, [#allocation5]  }
 0x30b   :  { %742 = dma.done.wait [#allocation5], 16  }
 0x30c   :  { %743 = vsyncadd [#allocation5], 4294967280 }
 0x30d   :  { %493 = vsyncpa [#allocation4], 1 }
 0x30e   :  { %494 = vsyncpa [#allocation7], 1 }
 0x30f   :  { %495 = vsyncpa [#allocation10], 1 }
 0x310   :  { %496 = vsyncpa [#allocation5], 1 }

</bundles_post_ra>
